<compile_context>
chip_gen: v7x
topology: tpu7x:2x2x1
jax: 0.10.0
libtpu: 0.0.40
codegen_flags: <defaults>
</compile_context>

<pallas_src>
import jax
import jax.numpy as jnp
from jax.experimental import pallas as pl
from jax.experimental.pallas import tpu as pltpu


def qnet_gru_kernel(sal_ref, h0_ref, ab_ref, gw_ref, mw_ref, q_ref, hout_ref):
    TB, Din = sal_ref.shape                                    # (T*Bp, S+2A)
    Bp, H = h0_ref.shape
    T = TB // Bp
    H2, H3 = 2 * H, 3 * H

    sal = sal_ref[...]                                         # (T*Bp, S+2A)

    # ---- fused linear1 | linear2 : one wide MXU matmul, lane-split result --
    w12 = ab_ref[0:Din, :]                                     # (Din, 2H)
    b12 = ab_ref[Din:Din + 1, :]                               # (1, 2H)
    fl = jnp.maximum(
        jnp.dot(sal, w12, preferred_element_type=jnp.float32) + b12, 0.0)
    fc = fl[:, 0:H]                                            # fc branch
    lx = fl[:, H:H2]                                           # lstm-branch input

    # ---- fused GRU input-to-hidden (all gates at once, kept as a value) ----
    wih = gw_ref[0:H, :]                                       # (H, 3H) [r|z|n]
    whh = gw_ref[H:H2, :]                                      # (H, 3H) [r|z|n]
    gib = gw_ref[H2:H2 + 1, :]                                 # (1, 3H) [br|bz|bin]
    bhn = gw_ref[H2 + 1:H2 + 2, H2:H3]                         # (1, H)
    gi = jnp.dot(lx, wih, preferred_element_type=jnp.float32) + gib   # (T*Bp, 3H)

    # ---- GRU recurrence (PyTorch gate order r, z, n), statically unrolled --
    h = h0_ref[...]                                            # (Bp, H)
    hs = []
    for t in range(T):
        gh = jnp.dot(h, whh, preferred_element_type=jnp.float32)      # (Bp, 3H)
        gt = gi[t * Bp:(t + 1) * Bp, :]                        # static sublane slice
        r = jax.nn.sigmoid(gt[:, 0:H] + gh[:, 0:H])
        z = jax.nn.sigmoid(gt[:, H:H2] + gh[:, H:H2])
        n = jnp.tanh(gt[:, H2:H3] + r * (gh[:, H2:H3] + bhn))
        h = (1.0 - z) * n + z * h
        hs.append(h)
    hout_ref[...] = h
    gru = jnp.concatenate(hs, axis=0)                          # (T*Bp, H)

    # ---- merge: split-weight linear3 (no lane concat) + linear4 ------------
    w3a = mw_ref[0:H, :]                                       # (H, H)
    w3b = mw_ref[H:H2, :]                                      # (H, H)
    b3 = mw_ref[H2:H2 + 1, :]                                  # (1, H)
    w4 = mw_ref[H2 + 1:H2 + 2, :]                              # (1, H)
    b4 = mw_ref[H2 + 2:H2 + 3, 0:1]                            # (1, 1)
    x = jnp.maximum(
        jnp.dot(fc, w3a, preferred_element_type=jnp.float32)
        + jnp.dot(gru, w3b, preferred_element_type=jnp.float32)
        + b3, 0.0)                                             # (T*Bp, H)

    # linear4 as VPU multiply + lane reduction; lane-dense (T, Bp) output.
    x3 = x.reshape(T, Bp, H)                                   # Bp % 8 == 0 -> aligned
    q = jnp.sum(x3 * w4.reshape(1, 1, H), axis=-1) + b4        # (T, Bp)
    q_ref[...] = q


def _qnetwork_gru_forward(params, state, action, last_action, hidden_in):
    """state (B,T,S), action/last_action (B,T,A), hidden_in (1,B,H) ->
       (q (B,T,1), hidden_out (1,B,H)) — same contract as QNetworkGRU.forward."""
    B, T, S = state.shape
    A = action.shape[-1]
    H = params["w1"].shape[1]
    Bp = ((B + 7) // 8) * 8                                    # pad batch to sublane tile
    pad = Bp - B
    f32 = jnp.float32

    # Layout glue (XLA, one jit): time-major, fused [state|action|last_action].
    st = jnp.transpose(state, (1, 0, 2)).astype(f32)
    ac = jnp.transpose(action, (1, 0, 2)).astype(f32)
    la = jnp.transpose(last_action, (1, 0, 2)).astype(f32)
    sal = jnp.concatenate([st, ac, la], axis=-1)               # (T, B, S+2A)
    if pad:
        sal = jnp.pad(sal, ((0, 0), (0, pad), (0, 0)))
    sal = sal.reshape(T * Bp, S + 2 * A)

    h0 = hidden_in[0].astype(f32)                              # (B, H)
    if pad:
        h0 = jnp.pad(h0, ((0, pad), (0, 0)))                   # (Bp, H)

    # Slab A: fused linear1/linear2 weights lifted to the (S+2A)-wide input,
    # plus fused bias row.  Shape (S+2A+1, 2H).
    zA = jnp.zeros((A, H), f32)
    w1x = jnp.concatenate([params["w1"], zA], axis=0)          # state|action|0
    w2x = jnp.concatenate([params["w2"][:S], zA, params["w2"][S:]], axis=0)
    ab = jnp.concatenate(
        [jnp.concatenate([w1x, w2x], axis=1),
         jnp.concatenate([params["b1"], params["b2"]], axis=1)], axis=0)

    # Slab B: GRU weights (gate order r|z|n), folded r/z biases, separate bhn.
    # Shape (2H+2, 3H).
    bih, bhh = params["bih"], params["bhh"]
    gib = jnp.concatenate([bih[:, :2 * H] + bhh[:, :2 * H], bih[:, 2 * H:]], axis=1)
    bhn_row = jnp.concatenate([jnp.zeros((1, 2 * H), f32), bhh[:, 2 * H:]], axis=1)
    gw = jnp.concatenate([params["wih"], params["whh"], gib, bhn_row], axis=0)

    # Slab C: split linear3 weights, b3, w4 row, b4 row.  Shape (2H+3, H).
    b4_row = jnp.pad(params["b4"], ((0, 0), (0, H - 1)))
    mw = jnp.concatenate([params["w3"][:H], params["w3"][H:],
                          params["b3"], params["w4"].T, b4_row], axis=0)

    vmem = lambda: pl.BlockSpec(memory_space=pltpu.MemorySpace.VMEM)

    q_tb, h_final = pl.pallas_call(
        qnet_gru_kernel,
        out_shape=(jax.ShapeDtypeStruct((T, Bp), jnp.float32),
                   jax.ShapeDtypeStruct((Bp, H), jnp.float32)),
        in_specs=[vmem() for _ in range(5)],
        out_specs=(vmem(), vmem()),
    )(sal, h0, ab, gw, mw)

    # TODO(synk): for large B on v7x, add a batch grid axis with
    # dimension_semantics=("parallel",) (carried per-tile hidden state) to use
    # both TensorCores, and re-budget VMEM against the 64 MiB cap.
    q = jnp.transpose(q_tb)[:B, :, None]                       # (B, T, 1)
    return q, h_final[:B][None]                                # (1, B, H)


qnetwork_gru_forward = jax.jit(_qnetwork_gru_forward)


def init_params(key, state_dim, action_dim, hidden_dim):
    """Deterministic synthetic init (PyTorch-style uniform(-1/sqrt(fan_in), ...))."""
    din = state_dim + action_dim
    H = hidden_dim
    ks = jax.random.split(key, 7)

    def lin(k, fan_in, fan_out):
        bound = 1.0 / (fan_in ** 0.5)
        kw, kb = jax.random.split(k)
        w = jax.random.uniform(kw, (fan_in, fan_out), jnp.float32, -bound, bound)
        b = jax.random.uniform(kb, (1, fan_out), jnp.float32, -bound, bound)
        return w, b

    w1, b1 = lin(ks[0], din, H)
    w2, b2 = lin(ks[1], din, H)
    # GRU: weight_ih (3H, H) / weight_hh (3H, H) stored transposed as (H, 3H);
    # gate order along the 3H axis is [r | z | n] (PyTorch convention).
    wih, bih = lin(ks[2], H, 3 * H)
    whh, bhh = lin(ks[3], H, 3 * H)
    w3, b3 = lin(ks[4], 2 * H, H)
    w4, b4 = lin(ks[5], H, 1)
    return dict(w1=w1, b1=b1, w2=w2, b2=b2,
                wih=wih, bih=bih, whh=whh, bhh=bhh,
                w3=w3, b3=b3, w4=w4, b4=b4)


def reference_forward(params, state, action, last_action, hidden_in):
    """Pure-JAX reference replicating the PyTorch forward, for verification."""
    st = jnp.transpose(state, (1, 0, 2))
    ac = jnp.transpose(action, (1, 0, 2))
    la = jnp.transpose(last_action, (1, 0, 2))
    H = params["w1"].shape[1]
    fc = jax.nn.relu(jnp.concatenate([st, ac], -1) @ params["w1"] + params["b1"])
    lx = jax.nn.relu(jnp.concatenate([st, la], -1) @ params["w2"] + params["b2"])
    h = hidden_in[0]
    outs = []
    for t in range(st.shape[0]):
        gi = lx[t] @ params["wih"] + params["bih"]
        gh = h @ params["whh"] + params["bhh"]
        r = jax.nn.sigmoid(gi[:, :H] + gh[:, :H])
        z = jax.nn.sigmoid(gi[:, H:2 * H] + gh[:, H:2 * H])
        n = jnp.tanh(gi[:, 2 * H:] + r * gh[:, 2 * H:])
        h = (1.0 - z) * n + z * h
        outs.append(h)
    gru = jnp.stack(outs, 0)
    x = jax.nn.relu(jnp.concatenate([fc, gru], -1) @ params["w3"] + params["b3"])
    q = x @ params["w4"] + params["b4"]
    return jnp.transpose(q, (1, 0, 2)), h[None]


if __name__ == "__main__":
    B, T = 2, 8
    STATE_DIM, ACTION_DIM, HIDDEN = 12, 4, 32

    key = jax.random.PRNGKey(0)
    kp, ks, ka, kl, kh = jax.random.split(key, 5)

    params = init_params(kp, STATE_DIM, ACTION_DIM, HIDDEN)
    state = jax.random.normal(ks, (B, T, STATE_DIM), jnp.float32)
    action = jax.random.normal(ka, (B, T, ACTION_DIM), jnp.float32)
    last_action = jax.random.normal(kl, (B, T, ACTION_DIM), jnp.float32)
    hidden_in = jax.random.normal(kh, (1, B, HIDDEN), jnp.float32)

    q, h_out = qnetwork_gru_forward(params, state, action, last_action, hidden_in)
    jax.block_until_ready((q, h_out))

    q_ref, h_ref = reference_forward(params, state, action, last_action, hidden_in)
    assert q.shape == (B, T, 1) and h_out.shape == (1, B, HIDDEN)
    assert jnp.allclose(q, q_ref, atol=3e-5, rtol=3e-5)
    assert jnp.allclose(h_out, h_ref, atol=3e-5, rtol=3e-5)

    print("KERNEL_OK")
</pallas_src>

<mosaic_0001>
module attributes {stable_mosaic.version = 11 : i64} {
  func.func @qnet_gru_kernel(%arg0: memref<64x20xf32, #tpu.memory_space<vmem>>, %arg1: memref<8x32xf32, #tpu.memory_space<vmem>>, %arg2: memref<21x64xf32, #tpu.memory_space<vmem>>, %arg3: memref<66x96xf32, #tpu.memory_space<vmem>>, %arg4: memref<67x32xf32, #tpu.memory_space<vmem>>, %arg5: memref<8x8xf32, #tpu.memory_space<vmem>>, %arg6: memref<8x32xf32, #tpu.memory_space<vmem>>) attributes {dimension_semantics = [], scalar_prefetch = 0 : i64, scratch_operands = 0 : i64, tpu.core_type = #tpu.core_type<tc>} {
    %c0 = arith.constant 0 : index
    %c0_0 = arith.constant 0 : index
    %0 = vector.load %arg0[%c0, %c0_0] : memref<64x20xf32, #tpu.memory_space<vmem>>, vector<64x20xf32>
    %c0_1 = arith.constant 0 : index
    %c0_2 = arith.constant 0 : index
    %1 = vector.load %arg2[%c0_1, %c0_2] : memref<21x64xf32, #tpu.memory_space<vmem>>, vector<20x64xf32>
    %c20 = arith.constant 20 : index
    %c0_3 = arith.constant 0 : index
    %2 = vector.load %arg2[%c20, %c0_3] : memref<21x64xf32, #tpu.memory_space<vmem>>, vector<1x64xf32>
    %cst = arith.constant dense<0.000000e+00> : vector<64x64xf32>
    %3 = tpu.matmul %0, %1, %cst {dimension_numbers = #tpu.dot_dimension_numbers<[1], [0], [0], [1], [0, 0, 1, 1], [], []>} : vector<64x20xf32>, vector<20x64xf32>, vector<64x64xf32> -> vector<64x64xf32>
    %4 = vector.broadcast %2 : vector<1x64xf32> to vector<64x64xf32>
    %5 = arith.addf %3, %4 : vector<64x64xf32>
    %cst_4 = arith.constant 0.000000e+00 : f32
    %6 = vector.broadcast %cst_4 : f32 to vector<64x64xf32>
    %7 = arith.maximumf %5, %6 : vector<64x64xf32>
    %8 = vector.extract_strided_slice %7 {offsets = [0, 0], sizes = [64, 32], strides = [1, 1]} : vector<64x64xf32> to vector<64x32xf32>
    %9 = vector.extract_strided_slice %7 {offsets = [0, 32], sizes = [64, 32], strides = [1, 1]} : vector<64x64xf32> to vector<64x32xf32>
    %c0_5 = arith.constant 0 : index
    %c0_6 = arith.constant 0 : index
    %10 = vector.load %arg3[%c0_5, %c0_6] : memref<66x96xf32, #tpu.memory_space<vmem>>, vector<32x96xf32>
    %c32 = arith.constant 32 : index
    %c0_7 = arith.constant 0 : index
    %11 = vector.load %arg3[%c32, %c0_7] : memref<66x96xf32, #tpu.memory_space<vmem>>, vector<32x96xf32>
    %c64 = arith.constant 64 : index
    %c0_8 = arith.constant 0 : index
    %12 = vector.load %arg3[%c64, %c0_8] : memref<66x96xf32, #tpu.memory_space<vmem>>, vector<1x96xf32>
    %c65 = arith.constant 65 : index
    %c64_9 = arith.constant 64 : index
    %13 = vector.load %arg3[%c65, %c64_9] : memref<66x96xf32, #tpu.memory_space<vmem>>, vector<1x32xf32>
    %cst_10 = arith.constant dense<0.000000e+00> : vector<64x96xf32>
    %14 = tpu.matmul %9, %10, %cst_10 {dimension_numbers = #tpu.dot_dimension_numbers<[1], [0], [0], [1], [0, 0, 1, 1], [], []>} : vector<64x32xf32>, vector<32x96xf32>, vector<64x96xf32> -> vector<64x96xf32>
    %15 = vector.broadcast %12 : vector<1x96xf32> to vector<64x96xf32>
    %16 = arith.addf %14, %15 : vector<64x96xf32>
    %c0_11 = arith.constant 0 : index
    %c0_12 = arith.constant 0 : index
    %17 = vector.load %arg1[%c0_11, %c0_12] : memref<8x32xf32, #tpu.memory_space<vmem>>, vector<8x32xf32>
    %cst_13 = arith.constant dense<0.000000e+00> : vector<8x96xf32>
    %18 = tpu.matmul %17, %11, %cst_13 {dimension_numbers = #tpu.dot_dimension_numbers<[1], [0], [0], [1], [0, 0, 1, 1], [], []>} : vector<8x32xf32>, vector<32x96xf32>, vector<8x96xf32> -> vector<8x96xf32>
    %19 = vector.extract_strided_slice %16 {offsets = [0, 0], sizes = [8, 96], strides = [1, 1]} : vector<64x96xf32> to vector<8x96xf32>
    %20 = vector.extract_strided_slice %19 {offsets = [0, 0], sizes = [8, 32], strides = [1, 1]} : vector<8x96xf32> to vector<8x32xf32>
    %21 = vector.extract_strided_slice %18 {offsets = [0, 0], sizes = [8, 32], strides = [1, 1]} : vector<8x96xf32> to vector<8x32xf32>
    %22 = arith.addf %20, %21 : vector<8x32xf32>
    %23 = arith.negf %22 : vector<8x32xf32>
    %24 = math.exp %23 : vector<8x32xf32>
    %cst_14 = arith.constant 1.000000e+00 : f32
    %25 = vector.broadcast %cst_14 : f32 to vector<8x32xf32>
    %26 = arith.addf %25, %24 : vector<8x32xf32>
    %27 = arith.divf %25, %26 : vector<8x32xf32>
    %28 = vector.extract_strided_slice %19 {offsets = [0, 32], sizes = [8, 32], strides = [1, 1]} : vector<8x96xf32> to vector<8x32xf32>
    %29 = vector.extract_strided_slice %18 {offsets = [0, 32], sizes = [8, 32], strides = [1, 1]} : vector<8x96xf32> to vector<8x32xf32>
    %30 = arith.addf %28, %29 : vector<8x32xf32>
    %31 = arith.negf %30 : vector<8x32xf32>
    %32 = math.exp %31 : vector<8x32xf32>
    %cst_15 = arith.constant 1.000000e+00 : f32
    %33 = vector.broadcast %cst_15 : f32 to vector<8x32xf32>
    %34 = arith.addf %33, %32 : vector<8x32xf32>
    %35 = arith.divf %33, %34 : vector<8x32xf32>
    %36 = vector.extract_strided_slice %19 {offsets = [0, 64], sizes = [8, 32], strides = [1, 1]} : vector<8x96xf32> to vector<8x32xf32>
    %37 = vector.extract_strided_slice %18 {offsets = [0, 64], sizes = [8, 32], strides = [1, 1]} : vector<8x96xf32> to vector<8x32xf32>
    %38 = vector.broadcast %13 : vector<1x32xf32> to vector<8x32xf32>
    %39 = arith.addf %37, %38 : vector<8x32xf32>
    %40 = arith.mulf %27, %39 : vector<8x32xf32>
    %41 = arith.addf %36, %40 : vector<8x32xf32>
    %42 = math.tanh %41 : vector<8x32xf32>
    %cst_16 = arith.constant 1.000000e+00 : f32
    %43 = vector.broadcast %cst_16 : f32 to vector<8x32xf32>
    %44 = arith.subf %43, %35 : vector<8x32xf32>
    %45 = arith.mulf %44, %42 : vector<8x32xf32>
    %46 = arith.mulf %35, %17 : vector<8x32xf32>
    %47 = arith.addf %45, %46 : vector<8x32xf32>
    %cst_17 = arith.constant dense<0.000000e+00> : vector<8x96xf32>
    %48 = tpu.matmul %47, %11, %cst_17 {dimension_numbers = #tpu.dot_dimension_numbers<[1], [0], [0], [1], [0, 0, 1, 1], [], []>} : vector<8x32xf32>, vector<32x96xf32>, vector<8x96xf32> -> vector<8x96xf32>
    %49 = vector.extract_strided_slice %16 {offsets = [8, 0], sizes = [8, 96], strides = [1, 1]} : vector<64x96xf32> to vector<8x96xf32>
    %50 = vector.extract_strided_slice %49 {offsets = [0, 0], sizes = [8, 32], strides = [1, 1]} : vector<8x96xf32> to vector<8x32xf32>
    %51 = vector.extract_strided_slice %48 {offsets = [0, 0], sizes = [8, 32], strides = [1, 1]} : vector<8x96xf32> to vector<8x32xf32>
    %52 = arith.addf %50, %51 : vector<8x32xf32>
    %53 = arith.negf %52 : vector<8x32xf32>
    %54 = math.exp %53 : vector<8x32xf32>
    %cst_18 = arith.constant 1.000000e+00 : f32
    %55 = vector.broadcast %cst_18 : f32 to vector<8x32xf32>
    %56 = arith.addf %55, %54 : vector<8x32xf32>
    %57 = arith.divf %55, %56 : vector<8x32xf32>
    %58 = vector.extract_strided_slice %49 {offsets = [0, 32], sizes = [8, 32], strides = [1, 1]} : vector<8x96xf32> to vector<8x32xf32>
    %59 = vector.extract_strided_slice %48 {offsets = [0, 32], sizes = [8, 32], strides = [1, 1]} : vector<8x96xf32> to vector<8x32xf32>
    %60 = arith.addf %58, %59 : vector<8x32xf32>
    %61 = arith.negf %60 : vector<8x32xf32>
    %62 = math.exp %61 : vector<8x32xf32>
    %cst_19 = arith.constant 1.000000e+00 : f32
    %63 = vector.broadcast %cst_19 : f32 to vector<8x32xf32>
    %64 = arith.addf %63, %62 : vector<8x32xf32>
    %65 = arith.divf %63, %64 : vector<8x32xf32>
    %66 = vector.extract_strided_slice %49 {offsets = [0, 64], sizes = [8, 32], strides = [1, 1]} : vector<8x96xf32> to vector<8x32xf32>
    %67 = vector.extract_strided_slice %48 {offsets = [0, 64], sizes = [8, 32], strides = [1, 1]} : vector<8x96xf32> to vector<8x32xf32>
    %68 = vector.broadcast %13 : vector<1x32xf32> to vector<8x32xf32>
    %69 = arith.addf %67, %68 : vector<8x32xf32>
    %70 = arith.mulf %57, %69 : vector<8x32xf32>
    %71 = arith.addf %66, %70 : vector<8x32xf32>
    %72 = math.tanh %71 : vector<8x32xf32>
    %cst_20 = arith.constant 1.000000e+00 : f32
    %73 = vector.broadcast %cst_20 : f32 to vector<8x32xf32>
    %74 = arith.subf %73, %65 : vector<8x32xf32>
    %75 = arith.mulf %74, %72 : vector<8x32xf32>
    %76 = arith.mulf %65, %47 : vector<8x32xf32>
    %77 = arith.addf %75, %76 : vector<8x32xf32>
    %cst_21 = arith.constant dense<0.000000e+00> : vector<8x96xf32>
    %78 = tpu.matmul %77, %11, %cst_21 {dimension_numbers = #tpu.dot_dimension_numbers<[1], [0], [0], [1], [0, 0, 1, 1], [], []>} : vector<8x32xf32>, vector<32x96xf32>, vector<8x96xf32> -> vector<8x96xf32>
    %79 = vector.extract_strided_slice %16 {offsets = [16, 0], sizes = [8, 96], strides = [1, 1]} : vector<64x96xf32> to vector<8x96xf32>
    %80 = vector.extract_strided_slice %79 {offsets = [0, 0], sizes = [8, 32], strides = [1, 1]} : vector<8x96xf32> to vector<8x32xf32>
    %81 = vector.extract_strided_slice %78 {offsets = [0, 0], sizes = [8, 32], strides = [1, 1]} : vector<8x96xf32> to vector<8x32xf32>
    %82 = arith.addf %80, %81 : vector<8x32xf32>
    %83 = arith.negf %82 : vector<8x32xf32>
    %84 = math.exp %83 : vector<8x32xf32>
    %cst_22 = arith.constant 1.000000e+00 : f32
    %85 = vector.broadcast %cst_22 : f32 to vector<8x32xf32>
    %86 = arith.addf %85, %84 : vector<8x32xf32>
    %87 = arith.divf %85, %86 : vector<8x32xf32>
    %88 = vector.extract_strided_slice %79 {offsets = [0, 32], sizes = [8, 32], strides = [1, 1]} : vector<8x96xf32> to vector<8x32xf32>
    %89 = vector.extract_strided_slice %78 {offsets = [0, 32], sizes = [8, 32], strides = [1, 1]} : vector<8x96xf32> to vector<8x32xf32>
    %90 = arith.addf %88, %89 : vector<8x32xf32>
    %91 = arith.negf %90 : vector<8x32xf32>
    %92 = math.exp %91 : vector<8x32xf32>
    %cst_23 = arith.constant 1.000000e+00 : f32
    %93 = vector.broadcast %cst_23 : f32 to vector<8x32xf32>
    %94 = arith.addf %93, %92 : vector<8x32xf32>
    %95 = arith.divf %93, %94 : vector<8x32xf32>
    %96 = vector.extract_strided_slice %79 {offsets = [0, 64], sizes = [8, 32], strides = [1, 1]} : vector<8x96xf32> to vector<8x32xf32>
    %97 = vector.extract_strided_slice %78 {offsets = [0, 64], sizes = [8, 32], strides = [1, 1]} : vector<8x96xf32> to vector<8x32xf32>
    %98 = vector.broadcast %13 : vector<1x32xf32> to vector<8x32xf32>
    %99 = arith.addf %97, %98 : vector<8x32xf32>
    %100 = arith.mulf %87, %99 : vector<8x32xf32>
    %101 = arith.addf %96, %100 : vector<8x32xf32>
    %102 = math.tanh %101 : vector<8x32xf32>
    %cst_24 = arith.constant 1.000000e+00 : f32
    %103 = vector.broadcast %cst_24 : f32 to vector<8x32xf32>
    %104 = arith.subf %103, %95 : vector<8x32xf32>
    %105 = arith.mulf %104, %102 : vector<8x32xf32>
    %106 = arith.mulf %95, %77 : vector<8x32xf32>
    %107 = arith.addf %105, %106 : vector<8x32xf32>
    %cst_25 = arith.constant dense<0.000000e+00> : vector<8x96xf32>
    %108 = tpu.matmul %107, %11, %cst_25 {dimension_numbers = #tpu.dot_dimension_numbers<[1], [0], [0], [1], [0, 0, 1, 1], [], []>} : vector<8x32xf32>, vector<32x96xf32>, vector<8x96xf32> -> vector<8x96xf32>
    %109 = vector.extract_strided_slice %16 {offsets = [24, 0], sizes = [8, 96], strides = [1, 1]} : vector<64x96xf32> to vector<8x96xf32>
    %110 = vector.extract_strided_slice %109 {offsets = [0, 0], sizes = [8, 32], strides = [1, 1]} : vector<8x96xf32> to vector<8x32xf32>
    %111 = vector.extract_strided_slice %108 {offsets = [0, 0], sizes = [8, 32], strides = [1, 1]} : vector<8x96xf32> to vector<8x32xf32>
    %112 = arith.addf %110, %111 : vector<8x32xf32>
    %113 = arith.negf %112 : vector<8x32xf32>
    %114 = math.exp %113 : vector<8x32xf32>
    %cst_26 = arith.constant 1.000000e+00 : f32
    %115 = vector.broadcast %cst_26 : f32 to vector<8x32xf32>
    %116 = arith.addf %115, %114 : vector<8x32xf32>
    %117 = arith.divf %115, %116 : vector<8x32xf32>
    %118 = vector.extract_strided_slice %109 {offsets = [0, 32], sizes = [8, 32], strides = [1, 1]} : vector<8x96xf32> to vector<8x32xf32>
    %119 = vector.extract_strided_slice %108 {offsets = [0, 32], sizes = [8, 32], strides = [1, 1]} : vector<8x96xf32> to vector<8x32xf32>
    %120 = arith.addf %118, %119 : vector<8x32xf32>
    %121 = arith.negf %120 : vector<8x32xf32>
    %122 = math.exp %121 : vector<8x32xf32>
    %cst_27 = arith.constant 1.000000e+00 : f32
    %123 = vector.broadcast %cst_27 : f32 to vector<8x32xf32>
    %124 = arith.addf %123, %122 : vector<8x32xf32>
    %125 = arith.divf %123, %124 : vector<8x32xf32>
    %126 = vector.extract_strided_slice %109 {offsets = [0, 64], sizes = [8, 32], strides = [1, 1]} : vector<8x96xf32> to vector<8x32xf32>
    %127 = vector.extract_strided_slice %108 {offsets = [0, 64], sizes = [8, 32], strides = [1, 1]} : vector<8x96xf32> to vector<8x32xf32>
    %128 = vector.broadcast %13 : vector<1x32xf32> to vector<8x32xf32>
    %129 = arith.addf %127, %128 : vector<8x32xf32>
    %130 = arith.mulf %117, %129 : vector<8x32xf32>
    %131 = arith.addf %126, %130 : vector<8x32xf32>
    %132 = math.tanh %131 : vector<8x32xf32>
    %cst_28 = arith.constant 1.000000e+00 : f32
    %133 = vector.broadcast %cst_28 : f32 to vector<8x32xf32>
    %134 = arith.subf %133, %125 : vector<8x32xf32>
    %135 = arith.mulf %134, %132 : vector<8x32xf32>
    %136 = arith.mulf %125, %107 : vector<8x32xf32>
    %137 = arith.addf %135, %136 : vector<8x32xf32>
    %cst_29 = arith.constant dense<0.000000e+00> : vector<8x96xf32>
    %138 = tpu.matmul %137, %11, %cst_29 {dimension_numbers = #tpu.dot_dimension_numbers<[1], [0], [0], [1], [0, 0, 1, 1], [], []>} : vector<8x32xf32>, vector<32x96xf32>, vector<8x96xf32> -> vector<8x96xf32>
    %139 = vector.extract_strided_slice %16 {offsets = [32, 0], sizes = [8, 96], strides = [1, 1]} : vector<64x96xf32> to vector<8x96xf32>
    %140 = vector.extract_strided_slice %139 {offsets = [0, 0], sizes = [8, 32], strides = [1, 1]} : vector<8x96xf32> to vector<8x32xf32>
    %141 = vector.extract_strided_slice %138 {offsets = [0, 0], sizes = [8, 32], strides = [1, 1]} : vector<8x96xf32> to vector<8x32xf32>
    %142 = arith.addf %140, %141 : vector<8x32xf32>
    %143 = arith.negf %142 : vector<8x32xf32>
    %144 = math.exp %143 : vector<8x32xf32>
    %cst_30 = arith.constant 1.000000e+00 : f32
    %145 = vector.broadcast %cst_30 : f32 to vector<8x32xf32>
    %146 = arith.addf %145, %144 : vector<8x32xf32>
    %147 = arith.divf %145, %146 : vector<8x32xf32>
    %148 = vector.extract_strided_slice %139 {offsets = [0, 32], sizes = [8, 32], strides = [1, 1]} : vector<8x96xf32> to vector<8x32xf32>
    %149 = vector.extract_strided_slice %138 {offsets = [0, 32], sizes = [8, 32], strides = [1, 1]} : vector<8x96xf32> to vector<8x32xf32>
    %150 = arith.addf %148, %149 : vector<8x32xf32>
    %151 = arith.negf %150 : vector<8x32xf32>
    %152 = math.exp %151 : vector<8x32xf32>
    %cst_31 = arith.constant 1.000000e+00 : f32
    %153 = vector.broadcast %cst_31 : f32 to vector<8x32xf32>
    %154 = arith.addf %153, %152 : vector<8x32xf32>
    %155 = arith.divf %153, %154 : vector<8x32xf32>
    %156 = vector.extract_strided_slice %139 {offsets = [0, 64], sizes = [8, 32], strides = [1, 1]} : vector<8x96xf32> to vector<8x32xf32>
    %157 = vector.extract_strided_slice %138 {offsets = [0, 64], sizes = [8, 32], strides = [1, 1]} : vector<8x96xf32> to vector<8x32xf32>
    %158 = vector.broadcast %13 : vector<1x32xf32> to vector<8x32xf32>
    %159 = arith.addf %157, %158 : vector<8x32xf32>
    %160 = arith.mulf %147, %159 : vector<8x32xf32>
    %161 = arith.addf %156, %160 : vector<8x32xf32>
    %162 = math.tanh %161 : vector<8x32xf32>
    %cst_32 = arith.constant 1.000000e+00 : f32
    %163 = vector.broadcast %cst_32 : f32 to vector<8x32xf32>
    %164 = arith.subf %163, %155 : vector<8x32xf32>
    %165 = arith.mulf %164, %162 : vector<8x32xf32>
    %166 = arith.mulf %155, %137 : vector<8x32xf32>
    %167 = arith.addf %165, %166 : vector<8x32xf32>
    %cst_33 = arith.constant dense<0.000000e+00> : vector<8x96xf32>
    %168 = tpu.matmul %167, %11, %cst_33 {dimension_numbers = #tpu.dot_dimension_numbers<[1], [0], [0], [1], [0, 0, 1, 1], [], []>} : vector<8x32xf32>, vector<32x96xf32>, vector<8x96xf32> -> vector<8x96xf32>
    %169 = vector.extract_strided_slice %16 {offsets = [40, 0], sizes = [8, 96], strides = [1, 1]} : vector<64x96xf32> to vector<8x96xf32>
    %170 = vector.extract_strided_slice %169 {offsets = [0, 0], sizes = [8, 32], strides = [1, 1]} : vector<8x96xf32> to vector<8x32xf32>
    %171 = vector.extract_strided_slice %168 {offsets = [0, 0], sizes = [8, 32], strides = [1, 1]} : vector<8x96xf32> to vector<8x32xf32>
    %172 = arith.addf %170, %171 : vector<8x32xf32>
    %173 = arith.negf %172 : vector<8x32xf32>
    %174 = math.exp %173 : vector<8x32xf32>
    %cst_34 = arith.constant 1.000000e+00 : f32
    %175 = vector.broadcast %cst_34 : f32 to vector<8x32xf32>
    %176 = arith.addf %175, %174 : vector<8x32xf32>
    %177 = arith.divf %175, %176 : vector<8x32xf32>
    %178 = vector.extract_strided_slice %169 {offsets = [0, 32], sizes = [8, 32], strides = [1, 1]} : vector<8x96xf32> to vector<8x32xf32>
    %179 = vector.extract_strided_slice %168 {offsets = [0, 32], sizes = [8, 32], strides = [1, 1]} : vector<8x96xf32> to vector<8x32xf32>
    %180 = arith.addf %178, %179 : vector<8x32xf32>
    %181 = arith.negf %180 : vector<8x32xf32>
    %182 = math.exp %181 : vector<8x32xf32>
    %cst_35 = arith.constant 1.000000e+00 : f32
    %183 = vector.broadcast %cst_35 : f32 to vector<8x32xf32>
    %184 = arith.addf %183, %182 : vector<8x32xf32>
    %185 = arith.divf %183, %184 : vector<8x32xf32>
    %186 = vector.extract_strided_slice %169 {offsets = [0, 64], sizes = [8, 32], strides = [1, 1]} : vector<8x96xf32> to vector<8x32xf32>
    %187 = vector.extract_strided_slice %168 {offsets = [0, 64], sizes = [8, 32], strides = [1, 1]} : vector<8x96xf32> to vector<8x32xf32>
    %188 = vector.broadcast %13 : vector<1x32xf32> to vector<8x32xf32>
    %189 = arith.addf %187, %188 : vector<8x32xf32>
    %190 = arith.mulf %177, %189 : vector<8x32xf32>
    %191 = arith.addf %186, %190 : vector<8x32xf32>
    %192 = math.tanh %191 : vector<8x32xf32>
    %cst_36 = arith.constant 1.000000e+00 : f32
    %193 = vector.broadcast %cst_36 : f32 to vector<8x32xf32>
    %194 = arith.subf %193, %185 : vector<8x32xf32>
    %195 = arith.mulf %194, %192 : vector<8x32xf32>
    %196 = arith.mulf %185, %167 : vector<8x32xf32>
    %197 = arith.addf %195, %196 : vector<8x32xf32>
    %cst_37 = arith.constant dense<0.000000e+00> : vector<8x96xf32>
    %198 = tpu.matmul %197, %11, %cst_37 {dimension_numbers = #tpu.dot_dimension_numbers<[1], [0], [0], [1], [0, 0, 1, 1], [], []>} : vector<8x32xf32>, vector<32x96xf32>, vector<8x96xf32> -> vector<8x96xf32>
    %199 = vector.extract_strided_slice %16 {offsets = [48, 0], sizes = [8, 96], strides = [1, 1]} : vector<64x96xf32> to vector<8x96xf32>
    %200 = vector.extract_strided_slice %199 {offsets = [0, 0], sizes = [8, 32], strides = [1, 1]} : vector<8x96xf32> to vector<8x32xf32>
    %201 = vector.extract_strided_slice %198 {offsets = [0, 0], sizes = [8, 32], strides = [1, 1]} : vector<8x96xf32> to vector<8x32xf32>
    %202 = arith.addf %200, %201 : vector<8x32xf32>
    %203 = arith.negf %202 : vector<8x32xf32>
    %204 = math.exp %203 : vector<8x32xf32>
    %cst_38 = arith.constant 1.000000e+00 : f32
    %205 = vector.broadcast %cst_38 : f32 to vector<8x32xf32>
    %206 = arith.addf %205, %204 : vector<8x32xf32>
    %207 = arith.divf %205, %206 : vector<8x32xf32>
    %208 = vector.extract_strided_slice %199 {offsets = [0, 32], sizes = [8, 32], strides = [1, 1]} : vector<8x96xf32> to vector<8x32xf32>
    %209 = vector.extract_strided_slice %198 {offsets = [0, 32], sizes = [8, 32], strides = [1, 1]} : vector<8x96xf32> to vector<8x32xf32>
    %210 = arith.addf %208, %209 : vector<8x32xf32>
    %211 = arith.negf %210 : vector<8x32xf32>
    %212 = math.exp %211 : vector<8x32xf32>
    %cst_39 = arith.constant 1.000000e+00 : f32
    %213 = vector.broadcast %cst_39 : f32 to vector<8x32xf32>
    %214 = arith.addf %213, %212 : vector<8x32xf32>
    %215 = arith.divf %213, %214 : vector<8x32xf32>
    %216 = vector.extract_strided_slice %199 {offsets = [0, 64], sizes = [8, 32], strides = [1, 1]} : vector<8x96xf32> to vector<8x32xf32>
    %217 = vector.extract_strided_slice %198 {offsets = [0, 64], sizes = [8, 32], strides = [1, 1]} : vector<8x96xf32> to vector<8x32xf32>
    %218 = vector.broadcast %13 : vector<1x32xf32> to vector<8x32xf32>
    %219 = arith.addf %217, %218 : vector<8x32xf32>
    %220 = arith.mulf %207, %219 : vector<8x32xf32>
    %221 = arith.addf %216, %220 : vector<8x32xf32>
    %222 = math.tanh %221 : vector<8x32xf32>
    %cst_40 = arith.constant 1.000000e+00 : f32
    %223 = vector.broadcast %cst_40 : f32 to vector<8x32xf32>
    %224 = arith.subf %223, %215 : vector<8x32xf32>
    %225 = arith.mulf %224, %222 : vector<8x32xf32>
    %226 = arith.mulf %215, %197 : vector<8x32xf32>
    %227 = arith.addf %225, %226 : vector<8x32xf32>
    %cst_41 = arith.constant dense<0.000000e+00> : vector<8x96xf32>
    %228 = tpu.matmul %227, %11, %cst_41 {dimension_numbers = #tpu.dot_dimension_numbers<[1], [0], [0], [1], [0, 0, 1, 1], [], []>} : vector<8x32xf32>, vector<32x96xf32>, vector<8x96xf32> -> vector<8x96xf32>
    %229 = vector.extract_strided_slice %16 {offsets = [56, 0], sizes = [8, 96], strides = [1, 1]} : vector<64x96xf32> to vector<8x96xf32>
    %230 = vector.extract_strided_slice %229 {offsets = [0, 0], sizes = [8, 32], strides = [1, 1]} : vector<8x96xf32> to vector<8x32xf32>
    %231 = vector.extract_strided_slice %228 {offsets = [0, 0], sizes = [8, 32], strides = [1, 1]} : vector<8x96xf32> to vector<8x32xf32>
    %232 = arith.addf %230, %231 : vector<8x32xf32>
    %233 = arith.negf %232 : vector<8x32xf32>
    %234 = math.exp %233 : vector<8x32xf32>
    %cst_42 = arith.constant 1.000000e+00 : f32
    %235 = vector.broadcast %cst_42 : f32 to vector<8x32xf32>
    %236 = arith.addf %235, %234 : vector<8x32xf32>
    %237 = arith.divf %235, %236 : vector<8x32xf32>
    %238 = vector.extract_strided_slice %229 {offsets = [0, 32], sizes = [8, 32], strides = [1, 1]} : vector<8x96xf32> to vector<8x32xf32>
    %239 = vector.extract_strided_slice %228 {offsets = [0, 32], sizes = [8, 32], strides = [1, 1]} : vector<8x96xf32> to vector<8x32xf32>
    %240 = arith.addf %238, %239 : vector<8x32xf32>
    %241 = arith.negf %240 : vector<8x32xf32>
    %242 = math.exp %241 : vector<8x32xf32>
    %cst_43 = arith.constant 1.000000e+00 : f32
    %243 = vector.broadcast %cst_43 : f32 to vector<8x32xf32>
    %244 = arith.addf %243, %242 : vector<8x32xf32>
    %245 = arith.divf %243, %244 : vector<8x32xf32>
    %246 = vector.extract_strided_slice %229 {offsets = [0, 64], sizes = [8, 32], strides = [1, 1]} : vector<8x96xf32> to vector<8x32xf32>
    %247 = vector.extract_strided_slice %228 {offsets = [0, 64], sizes = [8, 32], strides = [1, 1]} : vector<8x96xf32> to vector<8x32xf32>
    %248 = vector.broadcast %13 : vector<1x32xf32> to vector<8x32xf32>
    %249 = arith.addf %247, %248 : vector<8x32xf32>
    %250 = arith.mulf %237, %249 : vector<8x32xf32>
    %251 = arith.addf %246, %250 : vector<8x32xf32>
    %252 = math.tanh %251 : vector<8x32xf32>
    %cst_44 = arith.constant 1.000000e+00 : f32
    %253 = vector.broadcast %cst_44 : f32 to vector<8x32xf32>
    %254 = arith.subf %253, %245 : vector<8x32xf32>
    %255 = arith.mulf %254, %252 : vector<8x32xf32>
    %256 = arith.mulf %245, %227 : vector<8x32xf32>
    %257 = arith.addf %255, %256 : vector<8x32xf32>
    %c0_45 = arith.constant 0 : index
    %c0_46 = arith.constant 0 : index
    %258 = vector.load %arg6[%c0_45, %c0_46] : memref<8x32xf32, #tpu.memory_space<vmem>>, vector<8x32xf32>
    tpu.vector_store %arg6[%c0_45, %c0_46], %257 {strides = array<i32>} : memref<8x32xf32, #tpu.memory_space<vmem>>, vector<8x32xf32>,
    %259 = tpu.concatenate %47, %77, %107, %137, %167, %197, %227, %257 in 0 : vector<8x32xf32>, vector<8x32xf32>, vector<8x32xf32>, vector<8x32xf32>, vector<8x32xf32>, vector<8x32xf32>, vector<8x32xf32>, vector<8x32xf32> -> vector<64x32xf32>
    %c0_47 = arith.constant 0 : index
    %c0_48 = arith.constant 0 : index
    %260 = vector.load %arg4[%c0_47, %c0_48] : memref<67x32xf32, #tpu.memory_space<vmem>>, vector<32x32xf32>
    %c32_49 = arith.constant 32 : index
    %c0_50 = arith.constant 0 : index
    %261 = vector.load %arg4[%c32_49, %c0_50] : memref<67x32xf32, #tpu.memory_space<vmem>>, vector<32x32xf32>
    %c64_51 = arith.constant 64 : index
    %c0_52 = arith.constant 0 : index
    %262 = vector.load %arg4[%c64_51, %c0_52] : memref<67x32xf32, #tpu.memory_space<vmem>>, vector<1x32xf32>
    %c65_53 = arith.constant 65 : index
    %c0_54 = arith.constant 0 : index
    %263 = vector.load %arg4[%c65_53, %c0_54] : memref<67x32xf32, #tpu.memory_space<vmem>>, vector<1x32xf32>
    %c66 = arith.constant 66 : index
    %c0_55 = arith.constant 0 : index
    %264 = vector.load %arg4[%c66, %c0_55] : memref<67x32xf32, #tpu.memory_space<vmem>>, vector<1x1xf32>
    %cst_56 = arith.constant dense<0.000000e+00> : vector<64x32xf32>
    %265 = tpu.matmul %8, %260, %cst_56 {dimension_numbers = #tpu.dot_dimension_numbers<[1], [0], [0], [1], [0, 0, 1, 1], [], []>} : vector<64x32xf32>, vector<32x32xf32>, vector<64x32xf32> -> vector<64x32xf32>
    %cst_57 = arith.constant dense<0.000000e+00> : vector<64x32xf32>
    %266 = tpu.matmul %259, %261, %cst_57 {dimension_numbers = #tpu.dot_dimension_numbers<[1], [0], [0], [1], [0, 0, 1, 1], [], []>} : vector<64x32xf32>, vector<32x32xf32>, vector<64x32xf32> -> vector<64x32xf32>
    %267 = arith.addf %265, %266 : vector<64x32xf32>
    %268 = vector.broadcast %262 : vector<1x32xf32> to vector<64x32xf32>
    %269 = arith.addf %267, %268 : vector<64x32xf32>
    %cst_58 = arith.constant 0.000000e+00 : f32
    %270 = vector.broadcast %cst_58 : f32 to vector<64x32xf32>
    %271 = arith.maximumf %269, %270 : vector<64x32xf32>
    %272 = vector.shape_cast %271 : vector<64x32xf32> to vector<8x8x32xf32>
    %273 = vector.shape_cast %263 : vector<1x32xf32> to vector<1x1x32xf32>
    %274 = vector.broadcast %273 : vector<1x1x32xf32> to vector<8x8x32xf32>
    %275 = arith.mulf %272, %274 : vector<8x8x32xf32>
    %cst_59 = arith.constant dense<0.000000e+00> : vector<8x8xf32>
    %276 = vector.multi_reduction <add>, %275, %cst_59 [2] : vector<8x8x32xf32> to vector<8x8xf32>
    %277 = vector.broadcast %264 : vector<1x1xf32> to vector<8x8xf32>
    %278 = arith.addf %276, %277 : vector<8x8xf32>
    %c0_60 = arith.constant 0 : index
    %c0_61 = arith.constant 0 : index
    %279 = vector.load %arg5[%c0_60, %c0_61] : memref<8x8xf32, #tpu.memory_space<vmem>>, vector<8x8xf32>
    tpu.vector_store %arg5[%c0_60, %c0_61], %278 {strides = array<i32>} : memref<8x8xf32, #tpu.memory_space<vmem>>, vector<8x8xf32>,
    return
  }
}

</mosaic_0001>

<bundles_post_ra>
// kernel: _qnetwork_gru_forward.1
= control target key start
LH: loop header
LB: loop body
LE: loop exit
PB: predicated region body
PF: predicated region fallthrough
CT: control target
= control target key end

     0   :  { %vm38_vm0 = vcmask 162816   ;;  %vm63_vm1 = vcmask 1043456   ;;  %v1988_v8 = vmov 0.0|0.0   ;;  %vm1989_vm2 = vmmov 0   ;;  %s1991_s13 = smov 96   ;;  %s1992_s15 = smov 64   ;;  %s2398_s2 = inlined_call_operand.vmem [shape: f32[21,64], index: 2, kind: input, shape index: {}]   ;;  %s2399_s0 = inlined_call_operand.vmem [shape: f32[64,20], index: 0, kind: input, shape index: {}]   ;;  %s2400_s3 = inlined_call_operand.vmem [shape: f32[66,96], index: 3, kind: input, shape index: {}]   ;;  %s2401_s1 = inlined_call_operand.vmem [shape: f32[8,32], index: 1, kind: input, shape index: {}]   ;;  %s2402_s4 = inlined_call_operand.vmem [shape: f32[67,32], index: 4, kind: input, shape index: {}]   ;;  %s2403_s6 = inlined_call_operand.vmem [shape: f32[8,32], index: 6, kind: output, shape index: {1}]   ;;  %s2404_s5 = inlined_call_operand.vmem [shape: f32[8,8], index: 5, kind: output, shape index: {0}]  }
   0x1   :  { %v30_v0 = vld [vmem:[%s2398_s2] sm:$0xff]  ;;  %v31_v1 = vld [vmem:[%s2398_s2 + $0x8] sm:$0xff]  ;;  %v32_v4 = vld [vmem:[%s2398_s2 + $0x10] sm:$0xf]  ;;  %1860 = vmatprep.subr.bf16.mxu0 %v1988_v8  ;;  %v1990_v12 = vmov 0.0   ;;  %vm218_vm3 = vcmask 261120  }
   0x2   :  { %v1848_v2 = vpack.c.bf16 %v31_v1, %v30_v0  ;;  %v22_v3 = vld [vmem:[%s2399_s0] sm:$0xff]  ;;  %v23_v5 = vld [vmem:[%s2399_s0 + $0x8] sm:$0xff]  ;;  %v24_v6 = vld [vmem:[%s2399_s0 + $0x10] sm:$0xff]  ;;  %1728 = vmatprep.mubr.msk.f32.mxu0 %vm1989_vm2, %v1990_v12  ;;  %vm1516_vm4 = vcmask 1041409   ;;  %vm1518_vm5 = vcmask 1042434   ;;  %vm1520_vm6 = vcmask 1043459  }
   0x3   :  { %1688 = vmatprep.mubr.msk.f32.mxu1 %vm38_vm0, %v22_v3  ;;  %v25_v7 = vld [vmem:[%s2399_s0 + $0x18] sm:$0xff]  ;;  %v184_v9 = vld [vmem:[%s2400_s3 + $0x20] sm:$0xff]  ;;  %v185_v10 = vld [vmem:[%s2400_s3 + $0x28] sm:$0xff]  ;;  %vm1522_vm7 = vcmask 1044484   ;;  %vm1524_vm8 = vcmask 1045509   ;;  %vm1526_vm9 = vcmask 1046534  }
   0x4   :  { %1849 = vmatprep.subr.bf16.mxu1 %v1848_v2  ;;  %v186_v11 = vld [vmem:[%s2400_s3 + $0x30] sm:$0xff]  ;;  %v2064_v13 = vpack.c.bf16 %v185_v10, %v184_v9  ;;  %v187_v14 = vld [vmem:[%s2400_s3 + $0x38] sm:$0xff]  ;;  %v180_v15 = vld [vmem:[%s2400_s3] sm:$0xff]  ;;  %vm1528_vm10 = vcmask 1047559   ;;  %vm1531_vm11 = vcmask 64512  }
   0x5   :  { %1851 = vmatpush3.bf16.msra.mxu1 %v1848_v2  ;;  %v181_v16 = vld [vmem:[%s2400_s3 + $0x8] sm:$0xff]  ;;  %v26_v17 = vld [vmem:[%s2399_s0 + $0x20] sm:$0xff]  ;;  %v2081_v18 = vpack.c.bf16 %v187_v14, %v186_v11  ;;  %v182_v20 = vld [vmem:[%s2400_s3 + $0x10] sm:$0xff] }
   0x6   :  { %1686 = vmatprep.subr.msk.mxu1 %vm63_vm1, %v32_v4  ;;  %1862 = vmatpush3.bf16.msra.mxu0 %v2064_v13  ;;  %v1852_v19 = vpack.c.bf16 %v181_v16, %v180_v15  ;;  %v183_v21 = vld [vmem:[%s2400_s3 + $0x18] sm:$0xff]  ;;  %v27_v22 = vld [vmem:[%s2399_s0 + $0x28] sm:$0xff]  ;;  %v28_v24 = vld [vmem:[%s2399_s0 + $0x30] sm:$0xff] }
   0x7   :  { %1863 = vmatprep.subr.bf16.mxu0 %v1988_v8  ;;  %v1856_v23 = vpack.c.bf16 %v183_v21, %v182_v20  ;;  %v340_v25 = vld [vmem:[%s2401_s1] sm:$0xff]  ;;  %v29_v26 = vld [vmem:[%s2399_s0 + $0x38] sm:$0xff]  ;;  %v2119_v27 = vld [vmem:[%s2398_s2 + $0x14] ss:$0 sm:$0xff] }
   0x8   :  { %v2138_v37 = vld [vmem:[%s2400_s3 + $0x41] ss:$0 sm:$0xff]  ;;  %v2151_v46 = vld [vmem:[%s2400_s3 + $0x40] ss:$0 sm:$0xff]  ;;  %s1993_s3 = smov 32  }
   0x9   :  { %1687 = vmatpush3.msk.msra.mxu1 %vm63_vm1, %v32_v4 }
   0xa   :  { %1689 = vmatmul.mubr.msk.f32.vlgmr.msra.gmra.mrb[0].mxu1 %vm38_vm0, %v23_v5  ;;  %1853 = vmatprep.subr.bf16.mxu1 %v1852_v19 }
   0xb   :  { %1691 = vmatprep.mubr.msk.f32.mxu1 %vm38_vm0, %v24_v6  ;;  %1855 = vmatpush3.bf16.msra.mxu1 %v1852_v19 }
   0xc   :  { %1865 = vmatpush3.bf16.msra.mxu0 %v2081_v18  ;;  %1857 = vmatprep.subr.bf16.mxu1 %v1856_v23 }
   0xd   :  { %1872 = vmatprep.subr.bf16.mxu0 %v1988_v8 }
   0xe   :  { %1692 = vmatmul.mubr.msk.f32.gmra.mrb[2].mxu1 %vm38_vm0, %v25_v7 }
   0xf   :  { %1694 = vmatprep.mubr.msk.f32.mxu1 %vm38_vm0, %v26_v17  ;;  %1729 = vmatmul.mubr.msk.f32.vlgmr.msra.gmra.mrb[0].mxu0 %vm218_vm3, %v340_v25 }
  0x10   :  { %1859 = vmatpush3.bf16.msra.mxu1 %v1856_v23  ;;  %1874 = vmatpush3.bf16.msra.mxu0 %v2064_v13 }
  0x11   :  { %1866 = vmatprep.subr.bf16.mxu1 %v1988_v8  ;;  %1750 = vmatprep.mubr.msk.f32.mxu0 %vm1989_vm2, %v1990_v12 }
  0x12   :  { %1695 = vmatmul.mubr.msk.f32.gmra.mrb[4].mxu1 %vm38_vm0, %v27_v22  ;;  %1875 = vmatprep.subr.bf16.mxu0 %v1988_v8 }
  0x13   :  { %1697 = vmatprep.mubr.msk.f32.mxu1 %vm38_vm0, %v28_v24 }
  0x14   :  { %1877 = vmatpush3.bf16.msra.mxu0 %v2081_v18 }
  0x15   :  { %1884 = vmatprep.subr.bf16.mxu0 %v1988_v8 }
  0x16   :  { %1698 = vmatmul.mubr.msk.f32.gmra.mrb[6].mxu1 %vm38_vm0, %v29_v26 }
  0xdd   :  { %v1690_v28 = vpop.f32.mrb[0].mxu1 }
  0xde   :  { %v133_v29 = vpop.f32.mrb[1].mxu1  ;;  %v2125_v31 = vadd.f32 %v1690_v28, %v2119_v27 }
  0xdf   :  { %v2122_v30 = vadd.f32 %v2119_v27, %v133_v29 }
  0xe0   :  { %v173_v33 = vmax.f32 %v2125_v31, 0.0  ;;  %v1593_v31 = vld [vmem:[%s2402_s4 + $0x40] ss:$0 sm:$0xff] }
  0xe1   :  { %v172_v32 = vmax.f32 %v2122_v30, 0.0  ;;  %v1693_v34 = vpop.f32.mrb[2].mxu1  ;;  %v1177_v30 = vld [vmem:[%s2402_s4 + $0x42] sm:$0x1] }
  0xe2   :  { %v143_v35 = vpop.f32.mrb[3].mxu1  ;;  %v410_v39 = vpop.f32.mrb[0].mxu0  ;;  %v2158_v57 = vadd.f32 %v1693_v34, %v2119_v27  ;;  %1932 = vpush %v1177_v30 }
  0xe3   :  { %202 = vrot.lane.b32.xlu0 %v172_v32, %s1991_s13  ;;  %v1730_v40 = vpop.f32.mrb[1].mxu0  ;;  %v425_v41 = vadd.f32 %v2138_v37, %v410_v39  ;;  %v2179_v1 = vadd.f32 %v2119_v27, %v143_v35 }
  0xe4   :  { %v175_v58 = vmax.f32 %v2158_v57, 0.0 }
  0xe5   :  { %v1696_v36 = vpop.f32.mrb[4].mxu1  ;;  %427 = vrot.lane.b32.xlu1 %v425_v41, %s1992_s15  ;;  %v174_v3 = vmax.f32 %v2179_v1, 0.0 }
  0xe6   :  { %v153_v38 = vpop.f32.mrb[5].mxu1  ;;  %v2162_v59 = vadd.f32 %v1696_v36, %v2119_v27 }
  0xe7   :  { %204 = vrot.lane.b32.xlu0 %v173_v33, %s1991_s13  ;;  %v2184_v4 = vadd.f32 %v2119_v27, %v153_v38 }
  0xe8   :  { %v177_v60 = vmax.f32 %v2162_v59, 0.0  ;;  %v1594_v59 = vld [vmem:[%s2402_s4 + $0x41] ss:$0 sm:$0xff] }
  0xe9   :  { %v1699_v42 = vpop.f32.mrb[6].mxu1  ;;  %v176_v5 = vmax.f32 %v2184_v4, 0.0 }
  0xea   :  { %v163_v43 = vpop.f32.mrb[7].mxu1  ;;  %v2169_v61 = vadd.f32 %v1699_v42, %v2119_v27 }
  0xeb   :  { %v2191_v6 = vadd.f32 %v2119_v27, %v163_v43 }
  0xec   :  { %v179_v62 = vmax.f32 %v2169_v61, 0.0 }
  0xed   :  { %v178_v7 = vmax.f32 %v2191_v6, 0.0 }
 0x155   :  { %v203_v44 = vpop.permute.xlu0 %202 }
 0x156   :  { %1708 = vmatprep.mubr.msk.f32.mxu1 %vm218_vm3, %v203_v44 }
 0x157   :  { %v428_v54 = vpop.permute.xlu1 %427 }
 0x159   :  { %v205_v45 = vpop.permute.xlu0 %204 }
 0x15a   :  { %1709 = vmatmul.mubr.msk.f32.vlgmr.msra.gmra.mrb[8].mxu1 %vm218_vm3, %v205_v45 }
 0x15b   :  { %1868 = vmatpush3.bf16.msra.mxu1 %v2064_v13 }
 0x15c   :  { %1869 = vmatprep.subr.bf16.mxu1 %v1988_v8 }
 0x15f   :  { %1871 = vmatpush3.bf16.msra.mxu1 %v2081_v18 }
 0x160   :  { %1878 = vmatprep.subr.bf16.mxu1 %v1988_v8 }
 0x22d   :  { %v2153_v47 = vpop.f32.mrb[8].mxu1 }
 0x22e   :  { %v301_v48 = vpop.f32.mrb[9].mxu1 }
 0x22f   :  { %v302_v49 = vadd.f32 %v2151_v46, %v301_v48 }
 0x231   :  { %v414_v50 = vadd.f32 %v410_v39, %v302_v49  ;;  %v307_v39 = vadd.f32 %v2153_v47, %v2151_v46 }
 0x233   :  { %v1561_v51 = vmul.f32 -1.442695, %v414_v50 }
 0x235   :  { %1940 = vpow2.f32 %v1561_v51 }
 0x23f   :  { %v1941_v52 = vpop.eup %1940 }
 0x240   :  { %v418_v53 = vadd.f32 1.0, %v1941_v52 }
 0x242   :  { %1942 = vrcp.f32 %v418_v53 }
 0x24c   :  { %v1943_v55 = vpop.eup %1942 }
 0x24d   :  { %v430_v56 = vmul.f32 %v1943_v55, %v428_v54  ;;  %v437_v10 = vsub.f32 1.0, %v1943_v55 }
 0x24f   :  { %432 = vrot.lane.b32.xlu1 %v430_v56, %s1992_s15 }
 0x253   :  { %443 = vrot.lane.b32.xlu1 %v340_v25, %s1993_s3 }
 0x257   :  { %208 = vrot.lane.b32.xlu1 %v175_v58, %s1991_s13 }
 0x25b   :  { %212 = vrot.lane.b32.xlu1 %v177_v60, %s1991_s13 }
 0x25f   :  { %216 = vrot.lane.b32.xlu1 %v179_v62, %s1991_s13 }
 0x2c1   :  { %v433_v63 = vpop.permute.xlu1 %432 }
 0x2c2   :  { %v435_v0 = vadd.f32 %v433_v63, %v302_v49 }
 0x2c4   :  { %1944 = vtanh.f32 %v435_v0 }
 0x2c5   :  { %v444_v9 = vpop.permute.xlu1 %443 }
 0x2c6   :  { %v446_v14 = vmul.f32 %v1943_v55, %v444_v9 }
 0x2c9   :  { %v209_v15 = vpop.permute.xlu1 %208 }
 0x2cd   :  { %v213_v20 = vpop.permute.xlu1 %212 }
 0x2ce   :  { %v1945_v2 = vpop.eup %1944 }
 0x2cf   :  { %439 = vrot.lane.b32.xlu0 %v1945_v2, %s1991_s13 }
 0x2d1   :  { %v217_v23 = vpop.permute.xlu1 %216 }
 0x2d3   :  { %206 = vrot.lane.b32.xlu0 %v174_v3, %s1991_s13 }
 0x2d7   :  { %210 = vrot.lane.b32.xlu0 %v176_v5, %s1991_s13 }
 0x2db   :  { %214 = vrot.lane.b32.xlu0 %v178_v7, %s1991_s13 }
 0x341   :  { %v440_v11 = vpop.permute.xlu0 %439 }
 0x342   :  { %v442_v16 = vmul.f32 %v440_v11, %v437_v10 }
 0x344   :  { %v447_v17 = vadd.f32 %v446_v14, %v442_v16 }
 0x345   :  { %v207_v19 = vpop.permute.xlu0 %206 }
 0x346   :  { %1711 = vmatprep.mubr.msk.f32.mxu1 %vm218_vm3, %v207_v19  ;;  %449 = vrot.lane.b32.xlu0 %v447_v17, %s1991_s13 }
 0x347   :  { %1712 = vmatmul.mubr.msk.f32.gmra.mrb[10].mxu1 %vm218_vm3, %v209_v15 }
 0x349   :  { %v211_v21 = vpop.permute.xlu0 %210 }
 0x34a   :  { %1714 = vmatprep.mubr.msk.f32.mxu1 %vm218_vm3, %v211_v21 }
 0x34b   :  { %1715 = vmatmul.mubr.msk.f32.gmra.mrb[12].mxu1 %vm218_vm3, %v213_v20 }
 0x34d   :  { %v215_v22 = vpop.permute.xlu0 %214 }
 0x34e   :  { %1717 = vmatprep.mubr.msk.f32.mxu1 %vm218_vm3, %v215_v22 }
 0x34f   :  { %1718 = vmatmul.mubr.msk.f32.gmra.mrb[14].mxu1 %vm218_vm3, %v217_v23 }
 0x350   :  { %1739 = vmatprep.mubr.msk.f32.mxu1 %vm1989_vm2, %v1990_v12 }
 0x3b8   :  { %v2209_v24 = vpop.permute.xlu0 %449 }
 0x3b9   :  { %1740 = vmatmul.mubr.msk.f32.vlgmr.msra.gmra.mrb[16].mxu1 %vm218_vm3, %v2209_v24 }
 0x3ba   :  { %1880 = vmatpush3.bf16.msra.mxu1 %v2064_v13  ;;  %1761 = vmatprep.mubr.msk.f32.mxu1 %vm1989_vm2, %v1990_v12 }
 0x3bb   :  { %1881 = vmatprep.subr.bf16.mxu1 %v1988_v8 }
 0x3be   :  { %1883 = vmatpush3.bf16.msra.mxu1 %v2081_v18 }
 0x3bf   :  { %1890 = vmatprep.subr.bf16.mxu1 %v1988_v8 }
 0x41a   :  { %v2219_v25 = vpop.f32.mrb[10].mxu1 }
 0x41b   :  { %v311_v26 = vpop.f32.mrb[11].mxu1 }
 0x41c   :  { %v312_v9 = vadd.f32 %v2151_v46, %v311_v26 }
 0x41e   :  { %v2221_v27 = vpop.f32.mrb[12].mxu1 }
 0x41f   :  { %v2223_v28 = vpop.f32.mrb[13].mxu1 }
 0x422   :  { %v2225_v29 = vpop.f32.mrb[14].mxu1 }
 0x423   :  { %v2227_v34 = vpop.f32.mrb[15].mxu1 }
 0x48c   :  { %v519_v35 = vpop.f32.mrb[16].mxu1 }
 0x48d   :  { %v530_v36 = vadd.f32 %v2138_v37, %v519_v35  ;;  %v1741_v38 = vpop.f32.mrb[17].mxu1  ;;  %v523_v40 = vadd.f32 %v519_v35, %v307_v39 }
 0x48f   :  { %532 = vrot.lane.b32.xlu1 %v530_v36, %s1992_s15  ;;  %v1564_v41 = vmul.f32 -1.442695, %v523_v40 }
 0x491   :  { %1946 = vpow2.f32 %v1564_v41 }
 0x49b   :  { %v1947_v42 = vpop.eup %1946 }
 0x49c   :  { %v527_v43 = vadd.f32 1.0, %v1947_v42 }
 0x49e   :  { %1948 = vrcp.f32 %v527_v43  ;;  %v317_v43 = vadd.f32 %v2219_v25, %v2151_v46 }
 0x4a8   :  { %v1949_v44 = vpop.eup %1948 }
 0x4a9   :  { %v542_v52 = vsub.f32 1.0, %v1949_v44  ;;  %v548_v47 = vmul.f32 %v1949_v44, %v447_v17 }
 0x501   :  { %v533_v45 = vpop.permute.xlu1 %532 }
 0x502   :  { %v535_v48 = vmul.f32 %v1949_v44, %v533_v45 }
 0x504   :  { %537 = vrot.lane.b32.xlu0 %v535_v48, %s1992_s15 }
 0x576   :  { %v538_v49 = vpop.permute.xlu0 %537 }
 0x577   :  { %v540_v50 = vadd.f32 %v538_v49, %v307_v39 }
 0x579   :  { %1950 = vtanh.f32 %v540_v50 }
 0x583   :  { %v1951_v51 = vpop.eup %1950 }
 0x584   :  { %544 = vrot.lane.b32.xlu1 %v1951_v51, %s1991_s13 }
 0x5f6   :  { %v545_v53 = vpop.permute.xlu1 %544 }
 0x5f7   :  { %v547_v54 = vmul.f32 %v545_v53, %v542_v52 }
 0x5f9   :  { %v549_v55 = vadd.f32 %v548_v47, %v547_v54 }
 0x5fb   :  { %551 = vrot.lane.b32.xlu0 %v549_v55, %s1991_s13 }
 0x66d   :  { %v2236_v56 = vpop.permute.xlu0 %551 }
 0x66e   :  { %1751 = vmatmul.mubr.msk.f32.vlgmr.msra.gmra.mrb[2].mxu0 %vm218_vm3, %v2236_v56 }
 0x66f   :  { %1886 = vmatpush3.bf16.msra.mxu0 %v2064_v13  ;;  %1772 = vmatprep.mubr.msk.f32.mxu0 %vm1989_vm2, %v1990_v12 }
 0x670   :  { %1887 = vmatprep.subr.bf16.mxu0 %v1988_v8 }
 0x673   :  { %1889 = vmatpush3.bf16.msra.mxu0 %v2081_v18 }
 0x674   :  { %1896 = vmatprep.subr.bf16.mxu0 %v1988_v8 }
 0x741   :  { %v621_v63 = vpop.f32.mrb[2].mxu0 }
 0x742   :  { %v632_v0 = vadd.f32 %v2138_v37, %v621_v63  ;;  %v1752_v2 = vpop.f32.mrb[3].mxu0  ;;  %v625_v10 = vadd.f32 %v621_v63, %v312_v9 }
 0x744   :  { %634 = vrot.lane.b32.xlu1 %v632_v0, %s1992_s15  ;;  %v1566_v11 = vmul.f32 -1.442695, %v625_v10 }
 0x746   :  { %1952 = vpow2.f32 %v1566_v11 }
 0x750   :  { %v1953_v14 = vpop.eup %1952 }
 0x751   :  { %v629_v15 = vadd.f32 1.0, %v1953_v14 }
 0x753   :  { %1954 = vrcp.f32 %v629_v15  ;;  %v322_v15 = vadd.f32 %v2151_v46, %v2223_v28 }
 0x75d   :  { %v1955_v16 = vpop.eup %1954 }
 0x75e   :  { %v644_v23 = vsub.f32 1.0, %v1955_v16  ;;  %v650_v26 = vmul.f32 %v1955_v16, %v549_v55 }
 0x7b6   :  { %v635_v17 = vpop.permute.xlu1 %634 }
 0x7b7   :  { %v637_v19 = vmul.f32 %v1955_v16, %v635_v17 }
 0x7b9   :  { %639 = vrot.lane.b32.xlu0 %v637_v19, %s1992_s15 }
 0x82b   :  { %v640_v20 = vpop.permute.xlu0 %639 }
 0x82c   :  { %v642_v21 = vadd.f32 %v640_v20, %v312_v9 }
 0x82e   :  { %1956 = vtanh.f32 %v642_v21 }
 0x838   :  { %v1957_v22 = vpop.eup %1956 }
 0x839   :  { %646 = vrot.lane.b32.xlu1 %v1957_v22, %s1991_s13 }
 0x8ab   :  { %v647_v35 = vpop.permute.xlu1 %646 }
 0x8ac   :  { %v649_v36 = vmul.f32 %v647_v35, %v644_v23 }
 0x8ae   :  { %v651_v38 = vadd.f32 %v650_v26, %v649_v36 }
 0x8b0   :  { %653 = vrot.lane.b32.xlu0 %v651_v38, %s1991_s13 }
 0x922   :  { %v2252_v39 = vpop.permute.xlu0 %653 }
 0x923   :  { %1762 = vmatmul.mubr.msk.f32.vlgmr.msra.gmra.mrb[18].mxu1 %vm218_vm3, %v2252_v39 }
 0x924   :  { %1892 = vmatpush3.bf16.msra.mxu1 %v2064_v13  ;;  %1783 = vmatprep.mubr.msk.f32.mxu1 %vm1989_vm2, %v1990_v12 }
 0x925   :  { %1893 = vmatprep.subr.bf16.mxu1 %v1988_v8 }
 0x928   :  { %1895 = vmatpush3.bf16.msra.mxu1 %v2081_v18 }
 0x929   :  { %1902 = vmatprep.subr.bf16.mxu1 %v1988_v8 }
 0x9f6   :  { %v723_v40 = vpop.f32.mrb[18].mxu1 }
 0x9f7   :  { %v734_v41 = vadd.f32 %v2138_v37, %v723_v40  ;;  %v1763_v42 = vpop.f32.mrb[19].mxu1  ;;  %v727_v44 = vadd.f32 %v723_v40, %v317_v43 }
 0x9f9   :  { %736 = vrot.lane.b32.xlu1 %v734_v41, %s1992_s15  ;;  %v1568_v45 = vmul.f32 -1.442695, %v727_v44 }
 0x9fb   :  { %1958 = vpow2.f32 %v1568_v45 }
 0xa05   :  { %v1959_v48 = vpop.eup %1958 }
 0xa06   :  { %v731_v49 = vadd.f32 1.0, %v1959_v48 }
 0xa08   :  { %1960 = vrcp.f32 %v731_v49  ;;  %v327_v49 = vadd.f32 %v2221_v27, %v2151_v46  ;;  %v1172_v27 = vld [vmem:[%s2402_s4 + $0x28] sm:$0xff] }
 0xa12   :  { %v1961_v50 = vpop.eup %1960 }
 0xa13   :  { %v746_v55 = vsub.f32 1.0, %v1961_v50  ;;  %v752_v25 = vmul.f32 %v1961_v50, %v651_v38 }
 0xa6b   :  { %v737_v51 = vpop.permute.xlu1 %736 }
 0xa6c   :  { %v739_v52 = vmul.f32 %v1961_v50, %v737_v51 }
 0xa6e   :  { %741 = vrot.lane.b32.xlu0 %v739_v52, %s1992_s15 }
 0xae0   :  { %v742_v53 = vpop.permute.xlu0 %741 }
 0xae1   :  { %v744_v47 = vadd.f32 %v742_v53, %v317_v43 }
 0xae3   :  { %1962 = vtanh.f32 %v744_v47 }
 0xaed   :  { %v1963_v54 = vpop.eup %1962 }
 0xaee   :  { %748 = vrot.lane.b32.xlu1 %v1963_v54, %s1991_s13  ;;  %v1171_v54 = vld [vmem:[%s2402_s4 + $0x20] sm:$0xff] }
 0xb60   :  { %v749_v63 = vpop.permute.xlu1 %748 }
 0xb61   :  { %v751_v0 = vmul.f32 %v749_v63, %v746_v55  ;;  %v1908_v55 = vpack.c.bf16 %v1172_v27, %v1171_v54 }
 0xb63   :  { %v753_v2 = vadd.f32 %v752_v25, %v751_v0 }
 0xb65   :  { %755 = vrot.lane.b32.xlu0 %v753_v2, %s1991_s13 }
 0xbd7   :  { %v2269_v9 = vpop.permute.xlu0 %755 }
 0xbd8   :  { %1773 = vmatmul.mubr.msk.f32.vlgmr.msra.gmra.mrb[4].mxu0 %vm218_vm3, %v2269_v9 }
 0xbd9   :  { %1898 = vmatpush3.bf16.msra.mxu0 %v2064_v13  ;;  %1794 = vmatprep.mubr.msk.f32.mxu0 %vm1989_vm2, %v1990_v12 }
 0xbda   :  { %1899 = vmatprep.subr.bf16.mxu0 %v1988_v8 }
 0xbdd   :  { %1901 = vmatpush3.bf16.msra.mxu0 %v2081_v18 }
 0xbde   :  { %1909 = vmatprep.subr.bf16.mxu0 %v1908_v55 }
 0xcab   :  { %v825_v10 = vpop.f32.mrb[4].mxu0 }
 0xcac   :  { %v836_v11 = vadd.f32 %v2138_v37, %v825_v10  ;;  %v1774_v14 = vpop.f32.mrb[5].mxu0  ;;  %v829_v16 = vadd.f32 %v825_v10, %v322_v15 }
 0xcad   :  { %v1173_v14 = vld [vmem:[%s2402_s4 + $0x30] sm:$0xff] }
 0xcae   :  { %838 = vrot.lane.b32.xlu1 %v836_v11, %s1992_s15  ;;  %v1570_v17 = vmul.f32 -1.442695, %v829_v16 }
 0xcb0   :  { %1964 = vpow2.f32 %v1570_v17 }
 0xcba   :  { %v1965_v19 = vpop.eup %1964 }
 0xcbb   :  { %v833_v20 = vadd.f32 1.0, %v1965_v19 }
 0xcbd   :  { %1966 = vrcp.f32 %v833_v20 }
 0xcc7   :  { %v1967_v21 = vpop.eup %1966 }
 0xcc8   :  { %v848_v38 = vsub.f32 1.0, %v1967_v21  ;;  %v854_v28 = vmul.f32 %v1967_v21, %v753_v2 }
 0xd20   :  { %v839_v22 = vpop.permute.xlu1 %838 }
 0xd21   :  { %v841_v23 = vmul.f32 %v1967_v21, %v839_v22 }
 0xd23   :  { %843 = vrot.lane.b32.xlu0 %v841_v23, %s1992_s15 }
 0xd95   :  { %v844_v35 = vpop.permute.xlu0 %843 }
 0xd96   :  { %v846_v26 = vadd.f32 %v844_v35, %v322_v15  ;;  %v1174_v15 = vld [vmem:[%s2402_s4 + $0x38] sm:$0xff] }
 0xd97   :  { %v1912_v16 = vpack.c.bf16 %v1174_v15, %v1173_v14 }
 0xd98   :  { %1968 = vtanh.f32 %v846_v26 }
 0xda2   :  { %v1969_v36 = vpop.eup %1968 }
 0xda3   :  { %850 = vrot.lane.b32.xlu1 %v1969_v36, %s1991_s13 }
 0xe15   :  { %v851_v40 = vpop.permute.xlu1 %850 }
 0xe16   :  { %v853_v41 = vmul.f32 %v851_v40, %v848_v38 }
 0xe18   :  { %v855_v42 = vadd.f32 %v854_v28, %v853_v41 }
 0xe1a   :  { %857 = vrot.lane.b32.xlu0 %v855_v42, %s1991_s13 }
 0xe8c   :  { %v858_v43 = vpop.permute.xlu0 %857 }
 0xe8d   :  { %1784 = vmatmul.mubr.msk.f32.vlgmr.msra.gmra.mrb[20].mxu1 %vm218_vm3, %v858_v43 }
 0xe8e   :  { %1904 = vmatpush3.bf16.msra.mxu1 %v2064_v13  ;;  %1805 = vmatprep.mubr.msk.f32.mxu1 %vm1989_vm2, %v1990_v12 }
 0xe8f   :  { %1905 = vmatprep.subr.bf16.mxu1 %v1988_v8 }
 0xe92   :  { %1907 = vmatpush3.bf16.msra.mxu1 %v2081_v18 }
 0xf60   :  { %v927_v44 = vpop.f32.mrb[20].mxu1 }
 0xf61   :  { %v938_v45 = vadd.f32 %v2138_v37, %v927_v44  ;;  %v1785_v48 = vpop.f32.mrb[21].mxu1  ;;  %v931_v50 = vadd.f32 %v927_v44, %v327_v49 }
 0xf63   :  { %940 = vrot.lane.b32.xlu1 %v938_v45, %s1992_s15  ;;  %v1572_v51 = vmul.f32 -1.442695, %v931_v50  ;;  %v337_v50 = vadd.f32 %v2225_v29, %v2151_v46  ;;  %v1169_v29 = vld [vmem:[%s2402_s4 + $0x10] sm:$0xff] }
 0xf65   :  { %1970 = vpow2.f32 %v1572_v51 }
 0xf6f   :  { %v1971_v13 = vpop.eup %1970 }
 0xf70   :  { %v935_v52 = vadd.f32 1.0, %v1971_v13 }
 0xf72   :  { %1972 = vrcp.f32 %v935_v52 }
 0xf7c   :  { %v1973_v12 = vpop.eup %1972 }
 0xf7d   :  { %v950_v25 = vsub.f32 1.0, %v1973_v12  ;;  %v956_v2 = vmul.f32 %v1973_v12, %v855_v42 }
 0xfd5   :  { %v941_v53 = vpop.permute.xlu1 %940 }
 0xfd6   :  { %v943_v8 = vmul.f32 %v1973_v12, %v941_v53 }
 0xfd8   :  { %945 = vrot.lane.b32.xlu0 %v943_v8, %s1992_s15 }
0x104a   :  { %v946_v18 = vpop.permute.xlu0 %945 }
0x104b   :  { %v948_v47 = vadd.f32 %v946_v18, %v327_v49 }
0x104d   :  { %1974 = vtanh.f32 %v948_v47 }
0x1057   :  { %v1975_v63 = vpop.eup %1974 }
0x1058   :  { %952 = vrot.lane.b32.xlu1 %v1975_v63, %s1991_s13 }
0x10ca   :  { %v953_v0 = vpop.permute.xlu1 %952 }
0x10cb   :  { %v955_v10 = vmul.f32 %v953_v0, %v950_v25 }
0x10cd   :  { %v957_v11 = vadd.f32 %v956_v2, %v955_v10 }
0x10cf   :  { %959 = vrot.lane.b32.xlu0 %v957_v11, %s1991_s13 }
0x1141   :  { %v960_v17 = vpop.permute.xlu0 %959 }
0x1142   :  { %1795 = vmatmul.mubr.msk.f32.vlgmr.msra.gmra.mrb[6].mxu0 %vm218_vm3, %v960_v17 }
0x1143   :  { %1911 = vmatpush3.bf16.msra.mxu0 %v1908_v55  ;;  %1816 = vmatprep.mubr.msk.f32.mxu0 %vm218_vm3, %v2209_v24  ;;  %v332_v24 = vadd.f32 %v2151_v46, %v2227_v34  ;;  %v1168_v46 = vld [vmem:[%s2402_s4 + $0x8] sm:$0xff]  ;;  %v1170_v55 = vld [vmem:[%s2402_s4 + $0x18] sm:$0xff] }
0x1144   :  { %1913 = vmatprep.subr.bf16.mxu0 %v1912_v16  ;;  %v1920_v63 = vpack.c.bf16 %v1170_v55, %v1169_v29 }
0x1147   :  { %1915 = vmatpush3.bf16.msra.mxu0 %v1912_v16 }
0x114a   :  { %1817 = vmatmul.mubr.msk.f32.vlgmr.msra.gmra.mrb[8].mxu0 %vm218_vm3, %v2236_v56 }
0x114b   :  { %1819 = vmatprep.mubr.msk.f32.mxu0 %vm218_vm3, %v2252_v39 }
0x114e   :  { %1820 = vmatmul.mubr.msk.f32.gmra.mrb[10].mxu0 %vm218_vm3, %v2269_v9 }
0x114f   :  { %1822 = vmatprep.mubr.msk.f32.mxu0 %vm218_vm3, %v858_v43 }
0x1152   :  { %1823 = vmatmul.mubr.msk.f32.gmra.mrb[12].mxu0 %vm218_vm3, %v960_v17 }
0x1215   :  { %v1029_v19 = vpop.f32.mrb[6].mxu0 }
0x1216   :  { %v1040_v20 = vadd.f32 %v2138_v37, %v1029_v19  ;;  %v1796_v21 = vpop.f32.mrb[7].mxu0  ;;  %v1033_v56 = vadd.f32 %v1029_v19, %v332_v24 }
0x1218   :  { %1042 = vrot.lane.b32.xlu1 %v1040_v20, %s1992_s15  ;;  %v1574_v22 = vmul.f32 -1.442695, %v1033_v56 }
0x121a   :  { %1976 = vpow2.f32 %v1574_v22 }
0x1224   :  { %v1977_v39 = vpop.eup %1976 }
0x1225   :  { %v1037_v23 = vadd.f32 1.0, %v1977_v39 }
0x1227   :  { %1978 = vrcp.f32 %v1037_v23 }
0x1231   :  { %v1979_v9 = vpop.eup %1978 }
0x1232   :  { %v1052_v28 = vsub.f32 1.0, %v1979_v9  ;;  %v1058_v34 = vmul.f32 %v1979_v9, %v957_v11 }
0x128a   :  { %v1043_v35 = vpop.permute.xlu1 %1042 }
0x128b   :  { %v1045_v26 = vmul.f32 %v1979_v9, %v1043_v35 }
0x128d   :  { %1047 = vrot.lane.b32.xlu0 %v1045_v26, %s1992_s15 }
0x12ff   :  { %v1048_v36 = vpop.permute.xlu0 %1047 }
0x1300   :  { %v1050_v38 = vadd.f32 %v1048_v36, %v332_v24 }
0x1302   :  { %1980 = vtanh.f32 %v1050_v38 }
0x130c   :  { %v1981_v40 = vpop.eup %1980 }
0x130d   :  { %1054 = vrot.lane.b32.xlu1 %v1981_v40, %s1991_s13 }
0x137f   :  { %v1055_v41 = vpop.permute.xlu1 %1054 }
0x1380   :  { %v1057_v42 = vmul.f32 %v1055_v41, %v1052_v28 }
0x1382   :  { %v1059_v43 = vadd.f32 %v1058_v34, %v1057_v42 }
0x1384   :  { %1061 = vrot.lane.b32.xlu0 %v1059_v43, %s1991_s13 }
0x13f6   :  { %v1062_v44 = vpop.permute.xlu0 %1061 }
0x13f7   :  { %1806 = vmatmul.mubr.msk.f32.vlgmr.msra.gmra.mrb[22].mxu1 %vm218_vm3, %v1062_v44  ;;  %1825 = vmatprep.mubr.msk.f32.mxu0 %vm218_vm3, %v1062_v44 }
0x14ca   :  { %v1131_v45 = vpop.f32.mrb[22].mxu1 }
0x14cb   :  { %v1142_v48 = vadd.f32 %v2138_v37, %v1131_v45  ;;  %v1807_v49 = vpop.f32.mrb[23].mxu1  ;;  %v1135_v51 = vadd.f32 %v1131_v45, %v337_v50  ;;  %v1167_v37 = vld [vmem:[%s2402_s4] sm:$0xff]  ;;  %s1933_s4 = spop %1932 }
0x14cc   :  { %v1916_v27 = vpack.c.bf16 %v1168_v46, %v1167_v37 }
0x14cd   :  { %1144 = vrot.lane.b32.xlu1 %v1142_v48, %s1992_s15  ;;  %v1576_v13 = vmul.f32 -1.442695, %v1135_v51 }
0x14ce   :  { %1917 = vmatprep.subr.bf16.mxu0 %v1916_v27 }
0x14cf   :  { %1982 = vpow2.f32 %v1576_v13  ;;  %1919 = vmatpush3.bf16.msra.mxu0 %v1916_v27  ;;  %v1482_v13 = vlaneseq }
0x14d0   :  { %1921 = vmatprep.subr.bf16.mxu0 %v1920_v63 }
0x14d3   :  { %1923 = vmatpush3.bf16.msra.mxu0 %v1920_v63 }
0x14d9   :  { %v1983_v52 = vpop.eup %1982 }
0x14da   :  { %v1139_v12 = vadd.f32 1.0, %v1983_v52  ;;  %v1483_v52 = vand.u32 127, %v1482_v13 }
0x14dc   :  { %1984 = vrcp.f32 %v1139_v12  ;;  %v1485_v12 = vshrl.u32 %v1482_v13, 7 }
0x14e6   :  { %v1985_v53 = vpop.eup %1984 }
0x14e7   :  { %v1154_v0 = vsub.f32 1.0, %v1985_v53  ;;  %v1160_v10 = vmul.f32 %v1985_v53, %v1059_v43 }
0x153f   :  { %v1145_v8 = vpop.permute.xlu1 %1144 }
0x1540   :  { %v1147_v18 = vmul.f32 %v1985_v53, %v1145_v8  ;;  %v1464_v53 = vstv %s1933_s4 }
0x1542   :  { %1149 = vrot.lane.b32.xlu0 %v1147_v18, %s1992_s15  ;;  %v1486_v18 = vsub.s32 %v1483_v52, %v1485_v12 }
0x15b4   :  { %v1150_v47 = vpop.permute.xlu0 %1149 }
0x15b5   :  { %v1152_v54 = vadd.f32 %v1150_v47, %v337_v50 }
0x15b7   :  { %1986 = vtanh.f32 %v1152_v54 }
0x15c1   :  { %v1987_v25 = vpop.eup %1986 }
0x15c2   :  { %1156 = vrot.lane.b32.xlu1 %v1987_v25, %s1991_s13 }
0x1634   :  { %v1157_v2 = vpop.permute.xlu1 %1156 }
0x1635   :  { %v1159_v11 = vmul.f32 %v1157_v2, %v1154_v0 }
0x1637   :  { %v1161_v14 = vadd.f32 %v1160_v10, %v1159_v11 }
0x1639   :  { %1163 = vrot.lane.b32.xlu0 %v1161_v14, %s1991_s13 }
0x16ab   :  { %v1164_v15 = vpop.permute.xlu0 %1163 }
0x16ac   :  { %1166 = vst.msk [vmem:[%s2403_s6] sm:$0xff] %vm218_vm3, %v1164_v15  ;;  %1826 = vmatmul.mubr.msk.f32.gmra.mrb[14].mxu0 %vm218_vm3, %v1164_v15 }
0x16ad   :  { %1836 = vmatprep.mubr.msk.f32.mxu0 %vm218_vm3, %v172_v32 }
0x16b0   :  { %1837 = vmatmul.mubr.msk.f32.vlgmr.msra.gmra.mrb[8].mxu0 %vm218_vm3, %v173_v33 }
0x16b1   :  { %1839 = vmatprep.mubr.msk.f32.mxu0 %vm218_vm3, %v174_v3 }
0x16b4   :  { %1840 = vmatmul.mubr.msk.f32.gmra.mrb[10].mxu0 %vm218_vm3, %v175_v58 }
0x16b5   :  { %1842 = vmatprep.mubr.msk.f32.mxu0 %vm218_vm3, %v176_v5 }
0x16b8   :  { %1843 = vmatmul.mubr.msk.f32.gmra.mrb[12].mxu0 %vm218_vm3, %v177_v60 }
0x16b9   :  { %1845 = vmatprep.mubr.msk.f32.mxu0 %vm218_vm3, %v178_v7 }
0x16bc   :  { %1846 = vmatmul.mubr.msk.f32.gmra.mrb[14].mxu0 %vm218_vm3, %v179_v62 }
0x1783   :  { %v1838_v32 = vpop.f32.mrb[8].mxu0 }
0x1784   :  { %v1411_v33 = vadd.f32 %v1838_v32, %v1593_v31  ;;  %v1367_v57 = vpop.f32.mrb[9].mxu0 }
0x1785   :  { %v1410_v58 = vadd.f32 %v1593_v31, %v1367_v57 }
0x1786   :  { %v1419_v60 = vmax.f32 %v1411_v33, 0.0 }
0x1787   :  { %v1418_v61 = vmax.f32 %v1410_v58, 0.0  ;;  %v1841_v62 = vpop.f32.mrb[10].mxu0 }
0x1788   :  { %v1413_v1 = vadd.f32 %v1841_v62, %v1593_v31  ;;  %v1377_v3 = vpop.f32.mrb[11].mxu0  ;;  %v1431_v4 = vmul.f32 %v1594_v59, %v1419_v60 }
0x1789   :  { %v1412_v5 = vadd.f32 %v1593_v31, %v1377_v3  ;;  %v1430_v6 = vmul.f32 %v1594_v59, %v1418_v61 }
0x178a   :  { %v1421_v7 = vmax.f32 %v1413_v1, 0.0  ;;  %v1441_v16 = vsel %vm218_vm3, %v1431_v4, 0.0 }
0x178b   :  { %v1420_v17 = vmax.f32 %v1412_v5, 0.0  ;;  %1442 = vadd.xlane.f32.xlu0 %v1441_v16  ;;  %v1844_v19 = vpop.f32.mrb[12].mxu0  ;;  %v1438_v20 = vsel %vm218_vm3, %v1430_v6, 0.0 }
0x178c   :  { %v1415_v21 = vadd.f32 %v1844_v19, %v1593_v31  ;;  %1439 = vadd.xlane.f32.xlu1 %v1438_v20  ;;  %v1387_v24 = vpop.f32.mrb[13].mxu0  ;;  %v1433_v56 = vmul.f32 %v1594_v59, %v1421_v7 }
0x178d   :  { %v1414_v22 = vadd.f32 %v1593_v31, %v1387_v24  ;;  %v1432_v39 = vmul.f32 %v1594_v59, %v1420_v17 }
0x178e   :  { %v1423_v23 = vmax.f32 %v1415_v21, 0.0  ;;  %v1447_v9 = vsel %vm218_vm3, %v1433_v56, 0.0 }
0x178f   :  { %v1422_v35 = vmax.f32 %v1414_v22, 0.0  ;;  %v1847_v26 = vpop.f32.mrb[14].mxu0  ;;  %v1444_v36 = vsel %vm218_vm3, %v1432_v39, 0.0 }
0x1790   :  { %v1417_v38 = vadd.f32 %v1847_v26, %v1593_v31  ;;  %1448 = vadd.xlane.f32.xlu1 %v1447_v9  ;;  %1445 = vadd.xlane.f32.xlu0 %v1444_v36  ;;  %v1397_v40 = vpop.f32.mrb[15].mxu0  ;;  %v1435_v28 = vmul.f32 %v1594_v59, %v1423_v23 }
0x1791   :  { %v1416_v41 = vadd.f32 %v1593_v31, %v1397_v40  ;;  %v1434_v34 = vmul.f32 %v1594_v59, %v1422_v35 }
0x1792   :  { %v1425_v42 = vmax.f32 %v1417_v38, 0.0  ;;  %v1453_v43 = vsel %vm218_vm3, %v1435_v28, 0.0 }
0x1793   :  { %v1424_v44 = vmax.f32 %v1416_v41, 0.0  ;;  %v1450_v45 = vsel %vm218_vm3, %v1434_v34, 0.0 }
0x1794   :  { %1454 = vadd.xlane.f32.xlu1 %v1453_v43  ;;  %1451 = vadd.xlane.f32.xlu0 %v1450_v45  ;;  %v1437_v48 = vmul.f32 %v1594_v59, %v1425_v42 }
0x1795   :  { %v1436_v49 = vmul.f32 %v1594_v59, %v1424_v44 }
0x1796   :  { %v1459_v50 = vsel %vm218_vm3, %v1437_v48, 0.0 }
0x1797   :  { %v1456_v51 = vsel %vm218_vm3, %v1436_v49, 0.0 }
0x1798   :  { %1460 = vadd.xlane.f32.xlu1 %v1459_v50  ;;  %1457 = vadd.xlane.f32.xlu0 %v1456_v51 }
0x1818   :  { %v1443_v8 = vpop.xlane.xlu0 %1442 }
0x1819   :  { %v1467_v47 = vadd.f32 %v1464_v53, %v1443_v8  ;;  %v1440_v54 = vpop.xlane.xlu1 %1439 }
0x181a   :  { %v1466_v37 = vadd.f32 %v1464_v53, %v1440_v54 }
0x181b   :  { %v1491_v46 = vrot.slane %v1467_v47, %v1486_v18 }
0x181c   :  { %v1487_v29 = vrot.slane %v1466_v37, %v1486_v18 }
0x181d   :  { %v1449_v27 = vpop.xlane.xlu1 %1448  ;;  %v1446_v55 = vpop.xlane.xlu0 %1445 }
0x181e   :  { %v1469_v63 = vadd.f32 %v1464_v53, %v1449_v27  ;;  %v1468_v25 = vadd.f32 %v1464_v53, %v1446_v55  ;;  %v1517_v2 = vsel %vm1516_vm4, %v1491_v46, %v1487_v29 }
0x1820   :  { %v1495_v0 = vrot.slane %v1468_v25, %v1486_v18  ;;  %v1499_v10 = vrot.slane %v1469_v63, %v1486_v18 }
0x1821   :  { %v1455_v11 = vpop.xlane.xlu1 %1454  ;;  %v1452_v14 = vpop.xlane.xlu0 %1451 }
0x1822   :  { %v1519_v15 = vsel %vm1518_vm5, %v1495_v0, %v1517_v2  ;;  %v1471_v30 = vadd.f32 %v1464_v53, %v1455_v11  ;;  %v1470_v31 = vadd.f32 %v1464_v53, %v1452_v14 }
0x1823   :  { %v1521_v57 = vsel %vm1520_vm6, %v1499_v10, %v1519_v15 }
0x1824   :  { %v1503_v32 = vrot.slane %v1470_v31, %v1486_v18  ;;  %v1507_v33 = vrot.slane %v1471_v30, %v1486_v18 }
0x1825   :  { %v1461_v58 = vpop.xlane.xlu1 %1460  ;;  %v1458_v59 = vpop.xlane.xlu0 %1457 }
0x1826   :  { %v1523_v60 = vsel %vm1522_vm7, %v1503_v32, %v1521_v57  ;;  %v1473_v61 = vadd.f32 %v1464_v53, %v1461_v58  ;;  %v1472_v62 = vadd.f32 %v1464_v53, %v1458_v59 }
0x1827   :  { %v1525_v4 = vsel %vm1524_vm8, %v1507_v33, %v1523_v60 }
0x1828   :  { %v1515_v1 = vrot.slane %v1473_v61, %v1486_v18  ;;  %v1511_v3 = vrot.slane %v1472_v62, %v1486_v18 }
0x182a   :  { %v1527_v5 = vsel %vm1526_vm9, %v1511_v3, %v1525_v4 }
0x182b   :  { %v1529_v6 = vsel %vm1528_vm10, %v1515_v1, %v1527_v5 }
0x182c   :  { %1532 = vst.msk [vmem:[%s2404_s5] sm:$0xff] %vm1531_vm11, %v1529_v6 }

</bundles_post_ra>
